<compile_context>
chip_gen: v7x
topology: tpu7x:2x2x1
jax: 0.10.0
libtpu: 0.0.40
codegen_flags: <defaults>
</compile_context>

<pallas_src>
import functools

import jax
import jax.numpy as jnp
from jax import lax
from jax.experimental import pallas as pl
from jax.experimental.pallas import tpu as pltpu


def _round_up(x: int, m: int) -> int:
    return ((x + m - 1) // m) * m


def _gather_tile_kernel(idx_ref, table_ref, out_ref, *, tile_n: int, group: int):
    # idx_ref:   SMEM (n_pad,) int32   -- scalar-prefetched lookup indices
    # table_ref: VMEM (V_pad, H_pad)   -- whole table, resident (constant block)
    # out_ref:   VMEM (tile_n, H_pad)  -- output tile for this grid step
    base = pl.multiple_of(pl.program_id(0) * tile_n, tile_n)
    n_groups = tile_n // group

    def body(g, carry):
        g0 = pl.multiple_of(g * group, group)
        # Static inner unroll: the scheduler sees all `group` row copies at
        # once and can overlap the dynamic-row loads with the stores.
        for u in range(group):
            row = idx_ref[base + g0 + u]
            out_ref[pl.ds(g0 + u, 1), :] = table_ref[pl.ds(row, 1), :]
        return carry

    lax.fori_loop(0, n_groups, body, 0, unroll=n_groups <= 4)


def embedding_lookup(table: jax.Array, indices: jax.Array, *, tile_n: int = 256) -> jax.Array:
    """Gather rows of `table` at `indices` (== torch nn.Embedding forward).

    table:   (num_embeddings, hidden_dim)
    indices: any integer shape
    returns: indices.shape + (hidden_dim,) in table.dtype
    """
    vocab, hidden = table.shape
    idx_shape = indices.shape
    idx_flat = indices.reshape(-1)
    n = idx_flat.shape[0]

    # TPU-friendly padding: lane dim -> multiple of 128, sublane dims -> 8.
    h_pad = _round_up(hidden, 128)
    v_pad = _round_up(vocab, 8)
    tile_n = max(8, min(tile_n, _round_up(n, 8)))
    n_pad = _round_up(n, tile_n)
    num_tiles = n_pad // tile_n

    table_p = table
    if (v_pad, h_pad) != (vocab, hidden):
        table_p = jnp.pad(table, ((0, v_pad - vocab), (0, h_pad - hidden)))

    # Clamp indices so an out-of-range input cannot read past the table.
    idx = jnp.clip(idx_flat.astype(jnp.int32), 0, vocab - 1)
    if n_pad != n:
        idx = jnp.pad(idx, (0, n_pad - n))

    itemsize = jnp.dtype(table_p.dtype).itemsize
    table_bytes = v_pad * h_pad * itemsize
    out_block_bytes = tile_n * h_pad * itemsize
    # Keep at least the default scoped limit, raise for bigger tables, and stay
    # under v7x's 64 MiB physical VMEM.
    vmem_limit = int(min(60 * 2**20,
                         max(32 * 2**20, table_bytes + 4 * out_block_bytes + 4 * 2**20)))
    # TODO(synk): for vocabularies too large to be VMEM-resident (>~tens of MiB,
    # esp. on v7x), switch the table to memory_space=pl.ANY and do a
    # double-buffered pltpu.make_async_copy row gather from HBM instead.

    grid_spec = pltpu.PrefetchScalarGridSpec(
        num_scalar_prefetch=1,                 # indices -> SMEM, readable in-kernel
        grid=(num_tiles,),
        in_specs=[
            # Whole (padded) table as one block with a constant block index:
            # a single HBM->VMEM DMA, then resident for every grid step.
            pl.BlockSpec((v_pad, h_pad), lambda i, idx_ref: (0, 0)),
        ],
        out_specs=pl.BlockSpec((tile_n, h_pad), lambda i, idx_ref: (i, 0)),
    )

    out = pl.pallas_call(
        functools.partial(_gather_tile_kernel, tile_n=tile_n, group=8),
        out_shape=jax.ShapeDtypeStruct((n_pad, h_pad), table_p.dtype),
        grid_spec=grid_spec,
        compiler_params=pltpu.CompilerParams(
            dimension_semantics=("parallel",),  # disjoint output tiles; lets v7x use both TCs
            vmem_limit_bytes=vmem_limit,
        ),
    )(idx, table_p)

    return out[:n, :hidden].reshape(idx_shape + (hidden,))


class EmbeddingPallas:
    """Mirror of the PyTorch `Embedding` module (num_nodes + 1 rows)."""

    def __init__(self, num_nodes: int, hidden_dim: int, key: jax.Array):
        # Same shape as nn.Embedding(num_nodes + 1, hidden_dim).weight
        self.weight = jax.random.normal(
            key, (num_nodes + 1, hidden_dim), dtype=jnp.float32
        )

    def __call__(self, nodes: jax.Array) -> jax.Array:
        return embedding_lookup(self.weight, nodes)


if __name__ == "__main__":
    key = jax.random.PRNGKey(0)
    k_table, k_idx = jax.random.split(key)

    num_nodes = 16      # graph_user.num_nodes() stand-in
    hidden_dim = 128
    seq = 8             # number of user indices to look up

    model = EmbeddingPallas(num_nodes, hidden_dim, k_table)

    users = jax.random.randint(
        k_idx, (seq,), minval=0, maxval=num_nodes + 1, dtype=jnp.int32
    )

    out = model(users)
    out = jax.block_until_ready(out)

    # Reference check against plain JAX gather (== torch embedding semantics).
    ref = model.weight[users]
    assert out.shape == (seq, hidden_dim)
    assert jnp.allclose(out, ref)

    print("KERNEL_OK")
</pallas_src>

<mosaic_0001>
module attributes {stable_mosaic.version = 11 : i64} {
  func.func @_gather_tile_kernel(%arg0: i32, %arg1: memref<8xi32, #tpu.memory_space<smem>>, %arg2: memref<24x128xf32, #tpu.memory_space<vmem>>, %arg3: memref<8x128xf32, #tpu.memory_space<vmem>>) attributes {dimension_semantics = [#tpu.dimension_semantics<parallel>], iteration_bounds = array<i64: 1>, scalar_prefetch = 1 : i64, scratch_operands = 0 : i64, tpu.core_type = #tpu.core_type<tc>, window_params = [{pipeline_mode = #tpu.pipeline_mode<synchronous>, transform_indices = @transform_0, window_bounds = array<i64: 24, 128>}, {transform_indices = @transform_1, window_bounds = array<i64: 8, 128>}]} {
    %c8_i32 = arith.constant 8 : i32
    %0 = arith.muli %arg0, %c8_i32 : i32
    %1 = tpu.assume_multiple %0, 8 : i32
    %c0_i32 = arith.constant 0 : i32
    %c8_i32_0 = arith.constant 8 : i32
    %2 = arith.muli %c0_i32, %c8_i32_0 : i32
    %3 = tpu.assume_multiple %2, 8 : i32
    %4 = arith.addi %1, %3 : i32
    %c0_i32_1 = arith.constant 0 : i32
    %5 = arith.addi %4, %c0_i32_1 : i32
    %6 = arith.index_cast %5 : i32 to index
    %7 = memref.load %arg1[%6] : memref<8xi32, #tpu.memory_space<smem>>
    %8 = arith.index_cast %7 : i32 to index
    %c0 = arith.constant 0 : index
    %9 = vector.load %arg2[%8, %c0] : memref<24x128xf32, #tpu.memory_space<vmem>>, vector<1x128xf32>
    %c0_i32_2 = arith.constant 0 : i32
    %10 = arith.addi %3, %c0_i32_2 : i32
    %11 = arith.index_cast %10 : i32 to index
    %c0_3 = arith.constant 0 : index
    %12 = vector.load %arg3[%11, %c0_3] : memref<8x128xf32, #tpu.memory_space<vmem>>, vector<1x128xf32>
    tpu.vector_store %arg3[%11, %c0_3], %9 {strides = array<i32>} : memref<8x128xf32, #tpu.memory_space<vmem>>, vector<1x128xf32>,
    %13 = arith.addi %1, %3 : i32
    %c1_i32 = arith.constant 1 : i32
    %14 = arith.addi %13, %c1_i32 : i32
    %15 = arith.index_cast %14 : i32 to index
    %16 = memref.load %arg1[%15] : memref<8xi32, #tpu.memory_space<smem>>
    %17 = arith.index_cast %16 : i32 to index
    %c0_4 = arith.constant 0 : index
    %18 = vector.load %arg2[%17, %c0_4] : memref<24x128xf32, #tpu.memory_space<vmem>>, vector<1x128xf32>
    %c1_i32_5 = arith.constant 1 : i32
    %19 = arith.addi %3, %c1_i32_5 : i32
    %20 = arith.index_cast %19 : i32 to index
    %c0_6 = arith.constant 0 : index
    %21 = vector.load %arg3[%20, %c0_6] : memref<8x128xf32, #tpu.memory_space<vmem>>, vector<1x128xf32>
    tpu.vector_store %arg3[%20, %c0_6], %18 {strides = array<i32>} : memref<8x128xf32, #tpu.memory_space<vmem>>, vector<1x128xf32>,
    %22 = arith.addi %1, %3 : i32
    %c2_i32 = arith.constant 2 : i32
    %23 = arith.addi %22, %c2_i32 : i32
    %24 = arith.index_cast %23 : i32 to index
    %25 = memref.load %arg1[%24] : memref<8xi32, #tpu.memory_space<smem>>
    %26 = arith.index_cast %25 : i32 to index
    %c0_7 = arith.constant 0 : index
    %27 = vector.load %arg2[%26, %c0_7] : memref<24x128xf32, #tpu.memory_space<vmem>>, vector<1x128xf32>
    %c2_i32_8 = arith.constant 2 : i32
    %28 = arith.addi %3, %c2_i32_8 : i32
    %29 = arith.index_cast %28 : i32 to index
    %c0_9 = arith.constant 0 : index
    %30 = vector.load %arg3[%29, %c0_9] : memref<8x128xf32, #tpu.memory_space<vmem>>, vector<1x128xf32>
    tpu.vector_store %arg3[%29, %c0_9], %27 {strides = array<i32>} : memref<8x128xf32, #tpu.memory_space<vmem>>, vector<1x128xf32>,
    %31 = arith.addi %1, %3 : i32
    %c3_i32 = arith.constant 3 : i32
    %32 = arith.addi %31, %c3_i32 : i32
    %33 = arith.index_cast %32 : i32 to index
    %34 = memref.load %arg1[%33] : memref<8xi32, #tpu.memory_space<smem>>
    %35 = arith.index_cast %34 : i32 to index
    %c0_10 = arith.constant 0 : index
    %36 = vector.load %arg2[%35, %c0_10] : memref<24x128xf32, #tpu.memory_space<vmem>>, vector<1x128xf32>
    %c3_i32_11 = arith.constant 3 : i32
    %37 = arith.addi %3, %c3_i32_11 : i32
    %38 = arith.index_cast %37 : i32 to index
    %c0_12 = arith.constant 0 : index
    %39 = vector.load %arg3[%38, %c0_12] : memref<8x128xf32, #tpu.memory_space<vmem>>, vector<1x128xf32>
    tpu.vector_store %arg3[%38, %c0_12], %36 {strides = array<i32>} : memref<8x128xf32, #tpu.memory_space<vmem>>, vector<1x128xf32>,
    %40 = arith.addi %1, %3 : i32
    %c4_i32 = arith.constant 4 : i32
    %41 = arith.addi %40, %c4_i32 : i32
    %42 = arith.index_cast %41 : i32 to index
    %43 = memref.load %arg1[%42] : memref<8xi32, #tpu.memory_space<smem>>
    %44 = arith.index_cast %43 : i32 to index
    %c0_13 = arith.constant 0 : index
    %45 = vector.load %arg2[%44, %c0_13] : memref<24x128xf32, #tpu.memory_space<vmem>>, vector<1x128xf32>
    %c4_i32_14 = arith.constant 4 : i32
    %46 = arith.addi %3, %c4_i32_14 : i32
    %47 = arith.index_cast %46 : i32 to index
    %c0_15 = arith.constant 0 : index
    %48 = vector.load %arg3[%47, %c0_15] : memref<8x128xf32, #tpu.memory_space<vmem>>, vector<1x128xf32>
    tpu.vector_store %arg3[%47, %c0_15], %45 {strides = array<i32>} : memref<8x128xf32, #tpu.memory_space<vmem>>, vector<1x128xf32>,
    %49 = arith.addi %1, %3 : i32
    %c5_i32 = arith.constant 5 : i32
    %50 = arith.addi %49, %c5_i32 : i32
    %51 = arith.index_cast %50 : i32 to index
    %52 = memref.load %arg1[%51] : memref<8xi32, #tpu.memory_space<smem>>
    %53 = arith.index_cast %52 : i32 to index
    %c0_16 = arith.constant 0 : index
    %54 = vector.load %arg2[%53, %c0_16] : memref<24x128xf32, #tpu.memory_space<vmem>>, vector<1x128xf32>
    %c5_i32_17 = arith.constant 5 : i32
    %55 = arith.addi %3, %c5_i32_17 : i32
    %56 = arith.index_cast %55 : i32 to index
    %c0_18 = arith.constant 0 : index
    %57 = vector.load %arg3[%56, %c0_18] : memref<8x128xf32, #tpu.memory_space<vmem>>, vector<1x128xf32>
    tpu.vector_store %arg3[%56, %c0_18], %54 {strides = array<i32>} : memref<8x128xf32, #tpu.memory_space<vmem>>, vector<1x128xf32>,
    %58 = arith.addi %1, %3 : i32
    %c6_i32 = arith.constant 6 : i32
    %59 = arith.addi %58, %c6_i32 : i32
    %60 = arith.index_cast %59 : i32 to index
    %61 = memref.load %arg1[%60] : memref<8xi32, #tpu.memory_space<smem>>
    %62 = arith.index_cast %61 : i32 to index
    %c0_19 = arith.constant 0 : index
    %63 = vector.load %arg2[%62, %c0_19] : memref<24x128xf32, #tpu.memory_space<vmem>>, vector<1x128xf32>
    %c6_i32_20 = arith.constant 6 : i32
    %64 = arith.addi %3, %c6_i32_20 : i32
    %65 = arith.index_cast %64 : i32 to index
    %c0_21 = arith.constant 0 : index
    %66 = vector.load %arg3[%65, %c0_21] : memref<8x128xf32, #tpu.memory_space<vmem>>, vector<1x128xf32>
    tpu.vector_store %arg3[%65, %c0_21], %63 {strides = array<i32>} : memref<8x128xf32, #tpu.memory_space<vmem>>, vector<1x128xf32>,
    %67 = arith.addi %1, %3 : i32
    %c7_i32 = arith.constant 7 : i32
    %68 = arith.addi %67, %c7_i32 : i32
    %69 = arith.index_cast %68 : i32 to index
    %70 = memref.load %arg1[%69] : memref<8xi32, #tpu.memory_space<smem>>
    %71 = arith.index_cast %70 : i32 to index
    %c0_22 = arith.constant 0 : index
    %72 = vector.load %arg2[%71, %c0_22] : memref<24x128xf32, #tpu.memory_space<vmem>>, vector<1x128xf32>
    %c7_i32_23 = arith.constant 7 : i32
    %73 = arith.addi %3, %c7_i32_23 : i32
    %74 = arith.index_cast %73 : i32 to index
    %c0_24 = arith.constant 0 : index
    %75 = vector.load %arg3[%74, %c0_24] : memref<8x128xf32, #tpu.memory_space<vmem>>, vector<1x128xf32>
    tpu.vector_store %arg3[%74, %c0_24], %72 {strides = array<i32>} : memref<8x128xf32, #tpu.memory_space<vmem>>, vector<1x128xf32>,
    %c1_i32_25 = arith.constant 1 : i32
    return
  }
  func.func @transform_0(%arg0: i32, %arg1: memref<8xi32, #tpu.memory_space<smem>>) -> (i32, i32) {
    %c0_i32 = arith.constant 0 : i32
    %c0_i32_0 = arith.constant 0 : i32
    %c0_i32_1 = arith.constant 0 : i32
    return %c0_i32, %c0_i32_0 : i32, i32
  }
  func.func @transform_1(%arg0: i32, %arg1: memref<8xi32, #tpu.memory_space<smem>>) -> (i32, i32) {
    %c0_i32 = arith.constant 0 : i32
    %c0_i32_0 = arith.constant 0 : i32
    return %arg0, %c0_i32 : i32, i32
  }
}

</mosaic_0001>

<bundles_post_ra>
// kernel: tpu_custom_call.1
= control target key start
LH: loop header
LB: loop body
LE: loop exit
PB: predicated region body
PF: predicated region fallthrough
CT: control target
= control target key end

     0   :  { %s248_s0 = inlined_call_operand.hbm [shape: s32[8], index: 0, kind: input, shape index: {}]   ;;  %s249_s1 = inlined_call_operand.hbm [shape: f32[24,128], index: 1, kind: input, shape index: {}]   ;;  %s250_s2 = inlined_call_operand.hbm [shape: f32[8,128], index: 2, kind: output, shape index: {}]  }
   0x1   :  { %s125_s11 = scalar_lea.hbm %s248_s0, 16 }
   0x2   :  { %p126_p0 = scmp.ne.s32.totalorder %s248_s0, %s125_s11  ;;  %p129_p1 = scmp.lt.u32.totalorder %s125_s11, %s248_s0 }
   0x4   :  { %p131_p2 = pnand %p129_p1, %p126_p0 }
   0x6   :  { %134 = shalt.err (!%p131_p2)  }
   0x7   :  { %s185_s16 = smov [#allocation3]  }
   0x8   :  { %8 = dma.hbm_to_smem %s248_s0, 16, %s185_s16, [#allocation2] }
   0x9   :  { %179 = dma.done.wait [#allocation2], 16 }
   0xa   :  { %180 = vsyncadd [#allocation2], 4294967280 }
   0xb   :  { %10 = sfence }
   0xc   :  { %11 = vsyncpa [#allocation5], 0 }
   0xd   :  { %12 = vsyncpa [#allocation6], 0  ;;  %s186_s19 = smov [#allocation4]   ;;  %s135_s23 = scalar_lea.hbm %s249_s1, 384 }
   0xe   :  { %s18_s20 = sshll.u32 %s186_s19, 4  ;;  %p136_p3 = scmp.ne.s32.totalorder %s249_s1, %s135_s23  ;;  %s19_s20 = int_to_ptr.vmem [resolvable:$true] %s18_s20 }
   0xf   :  { %p139_p4 = scmp.lt.u32.totalorder %s135_s23, %s249_s1 }
  0x11   :  { %p141_p5 = pnand %p139_p4, %p136_p3 }
  0x13   :  { %144 = shalt.err (!%p141_p5)
}
  0x14   :  { %s145_s0 = scalar_lea.vmem %s19_s20, 384  ;;  %p150_p7 = scmp.lt.s32.totalorder %s19_s20, %s19_s20 }
  0x15   :  { %p146_p6 = scmp.ne.s32.totalorder %s19_s20, %s145_s0  ;;  %p151_p8 = scmp.lt.s32.totalorder %s145_s0, %s145_s0 }
  0x17   :  { %p152_p9 = por %p151_p8, %p150_p7 }
  0x19   :  { %p153_p10 = pnand %p152_p9, %p146_p6 }
  0x1b   :  { %156 = shalt.err (!%p153_p10)
}
  0x1c   :  { %s187_s28 = smov 128   ;;  %s188_s29 = smov 8  }
  0x1d   :  { %24 = dma.hbm_to_vmem [thread:$0]  %s249_s1, 384, %s19_s20, [#allocation5], %s187_s28, %s187_s28, %s188_s29  }
  0x1e   :  { %181 = dma.done.wait [#allocation5], 384  }
  0x1f   :  { %182 = vsyncadd [#allocation5], 4294966912  ;;  %s30_s4 = sld [smem:[#allocation3]]  ;;  %s113_s5 = sld [smem:[#allocation3 + $0x1]] }
  0x20   :  { %s114_s6 = sld [smem:[#allocation3 + $0x2]]  ;;  %s115_s7 = sld [smem:[#allocation3 + $0x3]] }
  0x21   :  { %s116_s8 = sld [smem:[#allocation3 + $0x4]]  ;;  %s117_s9 = sld [smem:[#allocation3 + $0x5]] }
  0x22   :  { %s118_s10 = sld [smem:[#allocation3 + $0x6]]  ;;  %s119_s11 = sld [smem:[#allocation3 + $0x7]] }
  0x23   :  { %s189_s12 = smov [#allocation7]  }
  0x24   :  { %s89_s13 = sshll.u32 %s189_s12, 4  ;;  %s229_s13 = int_to_ptr.vmem [resolvable:$true] %s89_s13 }
  0x25   :  { %s31_s14 = scalar_lea.vmem [#allocation4], %s30_s4  ;;  %s36_s15 = scalar_lea.vmem [#allocation4], %s113_s5 }
  0x26   :  { %v32_v0 = vld [vmem:[%s31_s14] sm:$0x1]  ;;  %s43_s1 = scalar_lea.vmem [#allocation4], %s114_s6  ;;  %s50_s16 = scalar_lea.vmem [#allocation4], %s115_s7 }
  0x27   :  { %v37_v1 = vld [vmem:[%s36_s15] sm:$0x1]  ;;  %33 = vst [vmem:[#allocation7] sm:$0x1] %v32_v0  ;;  %s57_s17 = scalar_lea.vmem [#allocation4], %s116_s8  ;;  %s64_s18 = scalar_lea.vmem [#allocation4], %s117_s9 }
  0x28   :  { %40 = vst [vmem:[#allocation7 + $0x1] sm:$0x1] %v37_v1  ;;  %v44_v2 = vld [vmem:[%s43_s1] sm:$0x1]  ;;  %s71_s19 = scalar_lea.vmem [#allocation4], %s118_s10  ;;  %s78_s20 = scalar_lea.vmem [#allocation4], %s119_s11 }
  0x29   :  { %v51_v3 = vld [vmem:[%s50_s16] sm:$0x1]  ;;  %47 = vst [vmem:[#allocation7 + $0x2] sm:$0x1] %v44_v2  ;;  %s157_s21 = scalar_lea.vmem %s229_s13, 128  ;;  %p162_p12 = scmp.lt.s32.totalorder %s229_s13, %s229_s13 }
  0x2a   :  { %54 = vst [vmem:[#allocation7 + $0x3] sm:$0x1] %v51_v3  ;;  %v58_v4 = vld [vmem:[%s57_s17] sm:$0x1]  ;;  %p158_p11 = scmp.ne.s32.totalorder %s229_s13, %s157_s21  ;;  %p163_p13 = scmp.lt.s32.totalorder %s157_s21, %s157_s21 }
  0x2b   :  { %v65_v5 = vld [vmem:[%s64_s18] sm:$0x1]  ;;  %61 = vst [vmem:[#allocation7 + $0x4] sm:$0x1] %v58_v4 }
  0x2c   :  { %68 = vst [vmem:[#allocation7 + $0x5] sm:$0x1] %v65_v5  ;;  %v72_v6 = vld [vmem:[%s71_s19] sm:$0x1]  ;;  %p164_p0 = por %p163_p13, %p162_p12 }
  0x2d   :  { %v79_v7 = vld [vmem:[%s78_s20] sm:$0x1]  ;;  %75 = vst [vmem:[#allocation7 + $0x6] sm:$0x1] %v72_v6 }
  0x2e   :  { %82 = vst [vmem:[#allocation7 + $0x7] sm:$0x1] %v79_v7  ;;  %p165_p1 = pnand %p164_p0, %p158_p11 }
  0x30   :  { %168 = shalt.err (!%p165_p1)
}
  0x31   :  { %s169_s24 = scalar_lea.hbm %s250_s2, 128 }
  0x32   :  { %p170_p2 = scmp.ne.s32.totalorder %s250_s2, %s169_s24  ;;  %p173_p3 = scmp.lt.u32.totalorder %s169_s24, %s250_s2 }
  0x34   :  { %p175_p4 = pnand %p173_p3, %p170_p2 }
  0x36   :  { %178 = shalt.err (!%p175_p4)
}
  0x37   :  { %92 = dma.vmem_to_hbm [thread:$0]  %s229_s13, 128, %s250_s2, [#allocation6]  }
  0x38   :  { %183 = dma.done.wait [#allocation6], 128  }
  0x39   :  { %184 = vsyncadd [#allocation6], 4294967168 }
  0x3a   :  { %96 = vsyncpa [#allocation5], 1 }
  0x3b   :  { %97 = vsyncpa [#allocation6], 1 }

</bundles_post_ra>
